<compile_context>
chip_gen: v7x
topology: tpu7x:2x2x1
jax: 0.10.0
libtpu: 0.0.40
codegen_flags: <defaults>
</compile_context>

<pallas_src>
import functools
import math

import jax
import jax.numpy as jnp
from jax.experimental import pallas as pl
from jax.experimental.pallas import tpu as pltpu


_GELU_C = math.sqrt(2.0 / math.pi)      # hoisted constant
_FUSED_VMEM_BUDGET_BYTES = 20 * 1024 * 1024   # conservative for v7x (32 MiB scoped)


def _round_up(x: int, m: int) -> int:
    return (x + m - 1) // m * m


def _gelu_tanh(x):
    # GELU(approximate='tanh'); x^3 computed as x * (x*x) to reuse the square.
    x_sq = x * x
    return 0.5 * x * (1.0 + jnp.tanh(_GELU_C * (x + 0.044715 * (x * x_sq))))


# ----------------------------------------------------------------------------
# Fused whole-MLP kernel: weights resident in VMEM, activations never hit HBM.
# ----------------------------------------------------------------------------
def _fused_mlp_kernel(x_ref, w_ref, b_ref, o_ref, *, num_layers, out_cols):
    # x_ref: (tm, Dp) bf16   w_ref: (L, Dp, Dp) bf16   b_ref: (L, 1, Dp) f32
    # o_ref: (tm, out_cols) f32
    h = x_ref[...]                                   # bf16 row tile
    acc = None
    for l in range(num_layers):                      # static unroll (small L)
        acc = jnp.dot(h, w_ref[l], preferred_element_type=jnp.float32)
        acc = acc + b_ref[l]                         # (1, Dp) broadcast, f32
        if l < num_layers - 1:
            acc = _gelu_tanh(acc)                    # f32 epilogue (v5e-safe)
            h = acc.astype(jnp.bfloat16)             # next layer's MXU input
    o_ref[...] = acc[:, :out_cols].astype(o_ref.dtype)


def _mlp_fused_pallas(x2d, ws, bs):
    """x2d: (M, in_dim) f32. ws: list of (in, out) f32. bs: list of (out,) f32."""
    M = x2d.shape[0]
    num_layers = len(ws)
    dims = [ws[0].shape[0]] + [w.shape[1] for w in ws]
    out_dim = dims[-1]
    d_pad = _round_up(max(dims), 128)                # lane-dense working width
    out_pad = _round_up(out_dim, 128)                # lane-dense output store

    # Pad & stack weights -> (L, Dp, Dp) bf16, biases -> (L, 1, Dp) f32.
    # Zero padding is exact: padded cols stay 0 through bias and GELU(0)=0.
    w_stack = jnp.zeros((num_layers, d_pad, d_pad), jnp.bfloat16)
    b_stack = jnp.zeros((num_layers, 1, d_pad), jnp.float32)
    for l, (w, b) in enumerate(zip(ws, bs)):
        w_stack = w_stack.at[l, : w.shape[0], : w.shape[1]].set(
            w.astype(jnp.bfloat16))
        b_stack = b_stack.at[l, 0, : b.shape[0]].set(b.astype(jnp.float32))

    tm = 256 if M >= 256 else _round_up(M, 8)
    m_pad = _round_up(M, tm)
    x_p = jnp.zeros((m_pad, d_pad), jnp.bfloat16)
    x_p = x_p.at[:M, : dims[0]].set(x2d.astype(jnp.bfloat16))

    kernel = functools.partial(
        _fused_mlp_kernel, num_layers=num_layers, out_cols=out_pad)
    out = pl.pallas_call(
        kernel,
        out_shape=jax.ShapeDtypeStruct((m_pad, out_pad), jnp.float32),
        grid=(m_pad // tm,),
        in_specs=[
            pl.BlockSpec((tm, d_pad), lambda i: (i, 0)),            # row tile
            pl.BlockSpec((num_layers, d_pad, d_pad), lambda i: (0, 0, 0)),
            pl.BlockSpec((num_layers, 1, d_pad), lambda i: (0, 0, 0)),
        ],
        out_specs=pl.BlockSpec((tm, out_pad), lambda i: (i, 0)),
        compiler_params=pltpu.CompilerParams(
            dimension_semantics=("parallel",),       # shard rows across TCs
        ),
    )(x_p, w_stack, b_stack)
    return out[:M, :out_dim]


# ----------------------------------------------------------------------------
# Fallback: per-layer tiled Linear(+GELU) with (M, N, K) grid + f32 accumulator.
# Tiles (256, 256, 512) keep ~2 MiB of double-buffered VMEM -> fits the default
# scoped VMEM on v5e / v6e / v7x with plenty of headroom.
# ----------------------------------------------------------------------------
def _linear_tiled_kernel(x_ref, w_ref, b_ref, o_ref, acc_ref, *, apply_gelu):
    k = pl.program_id(2)

    @pl.when(k == 0)
    def _():
        acc_ref[...] = jnp.zeros_like(acc_ref)

    acc_ref[...] += jnp.dot(x_ref[...], w_ref[...],
                            preferred_element_type=jnp.float32)

    @pl.when(k == pl.num_programs(2) - 1)
    def _():
        acc = acc_ref[...] + b_ref[...]              # bias only in the epilogue
        if apply_gelu:
            acc = _gelu_tanh(acc)
        o_ref[...] = acc.astype(o_ref.dtype)


def linear_pallas_tiled(x, w, b, *, apply_gelu, out_dtype=jnp.float32,
                        tm=256, tn=256, tk=512):
    """y = x @ w + b (+ tanh-GELU). x:(M,K) bf16, w:(K,N) bf16, b:(N,) f32."""
    M, K = x.shape
    Kw, N = w.shape
    assert K == Kw

    tm = tm if M >= tm else _round_up(M, 8)
    tn = tn if N >= tn else _round_up(N, 128)
    tk = tk if K >= tk else _round_up(K, 128)
    m_pad, n_pad, k_pad = _round_up(M, tm), _round_up(N, tn), _round_up(K, tk)

    x_p = x if (m_pad, k_pad) == (M, K) else jnp.pad(
        x, ((0, m_pad - M), (0, k_pad - K)))
    w_p = w if (k_pad, n_pad) == (K, N) else jnp.pad(
        w, ((0, k_pad - K), (0, n_pad - N)))
    b_p = (b if n_pad == N else jnp.pad(b, (0, n_pad - N)))
    b_p = b_p.reshape(1, n_pad).astype(jnp.float32)

    kernel = functools.partial(_linear_tiled_kernel, apply_gelu=apply_gelu)
    out = pl.pallas_call(
        kernel,
        out_shape=jax.ShapeDtypeStruct((m_pad, n_pad), out_dtype),
        grid=(m_pad // tm, n_pad // tn, k_pad // tk),   # reduction axis last
        in_specs=[
            pl.BlockSpec((tm, tk), lambda i, j, k: (i, k)),
            pl.BlockSpec((tk, tn), lambda i, j, k: (k, j)),
            pl.BlockSpec((1, tn), lambda i, j, k: (0, j)),
        ],
        out_specs=pl.BlockSpec((tm, tn), lambda i, j, k: (i, j)),
        scratch_shapes=[pltpu.VMEM((tm, tn), jnp.float32)],
        compiler_params=pltpu.CompilerParams(
            dimension_semantics=("parallel", "parallel", "arbitrary"),
        ),
    )(x_p, w_p, b_p)
    return out[:M, :N]


# ----------------------------------------------------------------------------
# Module-level API (mirrors the PyTorch MLP)
# ----------------------------------------------------------------------------
def init_mlp_params(key, input_dim, hidden_dim, output_dim, num_layers,
                    initializer_range=0.02):
    """Mirror MLP._init_weights: W ~ N(0, initializer_range), b = 0.
    Weights are stored pre-transposed as (in, out) so the forward pass never
    pays an XLA transpose (PyTorch nn.Linear stores (out, in))."""
    params = []
    for i in range(num_layers):
        in_dim = input_dim if i == 0 else hidden_dim
        out_dim = output_dim if i == num_layers - 1 else hidden_dim
        key, sub = jax.random.split(key)
        w = initializer_range * jax.random.normal(sub, (in_dim, out_dim),
                                                  jnp.float32)
        b = jnp.zeros((out_dim,), jnp.float32)
        params.append((w, b))
    return params


def mlp_forward(x, params):
    """x: [batch, seq, input_dim] -> [batch, seq, output_dim]."""
    batch, seq, in_dim = x.shape
    M = batch * seq
    h = x.reshape(M, in_dim)

    ws = [w for (w, _) in params]
    bs = [b for (_, b) in params]
    num_layers = len(ws)
    dims = [ws[0].shape[0]] + [w.shape[1] for w in ws]
    out_dim = dims[-1]
    d_pad = _round_up(max(dims), 128)
    out_pad = _round_up(out_dim, 128)

    # Would the fused kernel's VMEM footprint fit comfortably on all chips?
    fused_vmem = (num_layers * d_pad * d_pad * 2       # stacked bf16 weights
                  + num_layers * d_pad * 4             # biases
                  + 2 * 256 * d_pad * 2                # double-buffered x tile
                  + 2 * 256 * out_pad * 4)             # double-buffered out tile
    if fused_vmem <= _FUSED_VMEM_BUDGET_BYTES:
        out = _mlp_fused_pallas(h, ws, bs)
    else:
        h = h.astype(jnp.bfloat16)
        for i, (w, b) in enumerate(zip(ws, bs)):
            last = i == num_layers - 1
            h = linear_pallas_tiled(
                h, w.astype(jnp.bfloat16), b,
                apply_gelu=not last,
                out_dtype=jnp.float32 if last else jnp.bfloat16)
        out = h
    return out.reshape(batch, seq, out_dim)


def mlp_reference(x, params):
    """Plain-JAX f32 reference (PyTorch semantics) for sanity checking."""
    batch, seq, in_dim = x.shape
    h = x.reshape(batch * seq, in_dim)
    n = len(params)
    for i, (w, b) in enumerate(params):
        h = h @ w + b
        if i < n - 1:
            h = _gelu_tanh(h)
    return h.reshape(batch, seq, -1)


if __name__ == "__main__":
    key = jax.random.PRNGKey(0)
    key_x, key_p, key_x2, key_w2 = jax.random.split(key, 4)

    # --- Fused whole-MLP path (small DETR-head-like shapes) ------------------
    batch, seq = 2, 8
    input_dim, hidden_dim, output_dim, num_layers = 32, 64, 16, 3
    x = jax.random.normal(key_x, (batch, seq, input_dim), jnp.float32)
    params = init_mlp_params(key_p, input_dim, hidden_dim, output_dim,
                             num_layers, initializer_range=0.1)

    fwd = jax.jit(mlp_forward)
    out = jax.block_until_ready(fwd(x, params))
    ref = jax.block_until_ready(mlp_reference(x, params))
    assert out.shape == (batch, seq, output_dim), out.shape
    # bf16 matmul inputs (f32 accumulate) -> compare to f32 ref with bf16-level
    # tolerance.
    err = float(jnp.max(jnp.abs(out - ref)))
    assert jnp.allclose(out, ref, atol=2e-2, rtol=5e-2), f"fused mismatch {err}"

    # --- Tiled per-layer fallback path, exercised directly -------------------
    M2, K2, N2 = 200, 384, 320            # non-multiples to exercise padding
    x2 = jax.random.normal(key_x2, (M2, K2), jnp.float32)
    w2 = 0.05 * jax.random.normal(key_w2, (K2, N2), jnp.float32)
    b2 = 0.1 * jnp.ones((N2,), jnp.float32)
    y2 = linear_pallas_tiled(x2.astype(jnp.bfloat16), w2.astype(jnp.bfloat16),
                             b2, apply_gelu=True, out_dtype=jnp.float32)
    y2 = jax.block_until_ready(y2)
    y2_ref = _gelu_tanh(x2 @ w2 + b2)
    assert y2.shape == (M2, N2), y2.shape
    err2 = float(jnp.max(jnp.abs(y2 - y2_ref)))
    assert jnp.allclose(y2, y2_ref, atol=3e-2, rtol=3e-2), f"tiled mismatch {err2}"

    print("KERNEL_OK")
</pallas_src>

<mosaic_0001>
module attributes {stable_mosaic.version = 11 : i64} {
  func.func @_fused_mlp_kernel(%arg0: i32, %arg1: memref<16x128xbf16, #tpu.memory_space<vmem>>, %arg2: memref<3x128x128xbf16, #tpu.memory_space<vmem>>, %arg3: memref<3x1x128xf32, #tpu.memory_space<vmem>>, %arg4: memref<16x128xf32, #tpu.memory_space<vmem>>) attributes {dimension_semantics = [#tpu.dimension_semantics<parallel>], iteration_bounds = array<i64: 1>, scalar_prefetch = 0 : i64, scratch_operands = 0 : i64, tpu.core_type = #tpu.core_type<tc>, window_params = [{transform_indices = @transform_0, window_bounds = array<i64: 16, 128>}, {pipeline_mode = #tpu.pipeline_mode<synchronous>, transform_indices = @transform_1, window_bounds = array<i64: 3, 128, 128>}, {pipeline_mode = #tpu.pipeline_mode<synchronous>, transform_indices = @transform_2, window_bounds = array<i64: 3, 1, 128>}, {transform_indices = @transform_3, window_bounds = array<i64: 16, 128>}]} {
    %c0 = arith.constant 0 : index
    %c0_0 = arith.constant 0 : index
    %0 = vector.load %arg1[%c0, %c0_0] : memref<16x128xbf16, #tpu.memory_space<vmem>>, vector<16x128xbf16>
    %c0_1 = arith.constant 0 : index
    %c0_2 = arith.constant 0 : index
    %c0_3 = arith.constant 0 : index
    %1 = vector.load %arg2[%c0_1, %c0_2, %c0_3] : memref<3x128x128xbf16, #tpu.memory_space<vmem>>, vector<1x128x128xbf16>
    %2 = vector.shape_cast %1 : vector<1x128x128xbf16> to vector<128x128xbf16>
    %cst = arith.constant dense<0.000000e+00> : vector<16x128xf32>
    %3 = tpu.matmul %0, %2, %cst {dimension_numbers = #tpu.dot_dimension_numbers<[1], [0], [0], [1], [0, 0, 1, 1], [], []>} : vector<16x128xbf16>, vector<128x128xbf16>, vector<16x128xf32> -> vector<16x128xf32>
    %c0_4 = arith.constant 0 : index
    %c0_5 = arith.constant 0 : index
    %c0_6 = arith.constant 0 : index
    %4 = vector.load %arg3[%c0_4, %c0_5, %c0_6] : memref<3x1x128xf32, #tpu.memory_space<vmem>>, vector<1x1x128xf32>
    %5 = vector.shape_cast %4 : vector<1x1x128xf32> to vector<1x128xf32>
    %6 = vector.broadcast %5 : vector<1x128xf32> to vector<16x128xf32>
    %7 = arith.addf %3, %6 : vector<16x128xf32>
    %8 = arith.mulf %7, %7 : vector<16x128xf32>
    %cst_7 = arith.constant 5.000000e-01 : f32
    %9 = vector.broadcast %cst_7 : f32 to vector<16x128xf32>
    %10 = arith.mulf %9, %7 : vector<16x128xf32>
    %11 = arith.mulf %7, %8 : vector<16x128xf32>
    %cst_8 = arith.constant 4.471500e-02 : f32
    %12 = vector.broadcast %cst_8 : f32 to vector<16x128xf32>
    %13 = arith.mulf %12, %11 : vector<16x128xf32>
    %14 = arith.addf %7, %13 : vector<16x128xf32>
    %cst_9 = arith.constant 0.797884583 : f32
    %15 = vector.broadcast %cst_9 : f32 to vector<16x128xf32>
    %16 = arith.mulf %15, %14 : vector<16x128xf32>
    %17 = math.tanh %16 : vector<16x128xf32>
    %cst_10 = arith.constant 1.000000e+00 : f32
    %18 = vector.broadcast %cst_10 : f32 to vector<16x128xf32>
    %19 = arith.addf %18, %17 : vector<16x128xf32>
    %20 = arith.mulf %10, %19 : vector<16x128xf32>
    %21 = arith.truncf %20 : vector<16x128xf32> to vector<16x128xbf16>
    %c1 = arith.constant 1 : index
    %c0_11 = arith.constant 0 : index
    %c0_12 = arith.constant 0 : index
    %22 = vector.load %arg2[%c1, %c0_11, %c0_12] : memref<3x128x128xbf16, #tpu.memory_space<vmem>>, vector<1x128x128xbf16>
    %23 = vector.shape_cast %22 : vector<1x128x128xbf16> to vector<128x128xbf16>
    %cst_13 = arith.constant dense<0.000000e+00> : vector<16x128xf32>
    %24 = tpu.matmul %21, %23, %cst_13 {dimension_numbers = #tpu.dot_dimension_numbers<[1], [0], [0], [1], [0, 0, 1, 1], [], []>} : vector<16x128xbf16>, vector<128x128xbf16>, vector<16x128xf32> -> vector<16x128xf32>
    %c1_14 = arith.constant 1 : index
    %c0_15 = arith.constant 0 : index
    %c0_16 = arith.constant 0 : index
    %25 = vector.load %arg3[%c1_14, %c0_15, %c0_16] : memref<3x1x128xf32, #tpu.memory_space<vmem>>, vector<1x1x128xf32>
    %26 = vector.shape_cast %25 : vector<1x1x128xf32> to vector<1x128xf32>
    %27 = vector.broadcast %26 : vector<1x128xf32> to vector<16x128xf32>
    %28 = arith.addf %24, %27 : vector<16x128xf32>
    %29 = arith.mulf %28, %28 : vector<16x128xf32>
    %cst_17 = arith.constant 5.000000e-01 : f32
    %30 = vector.broadcast %cst_17 : f32 to vector<16x128xf32>
    %31 = arith.mulf %30, %28 : vector<16x128xf32>
    %32 = arith.mulf %28, %29 : vector<16x128xf32>
    %cst_18 = arith.constant 4.471500e-02 : f32
    %33 = vector.broadcast %cst_18 : f32 to vector<16x128xf32>
    %34 = arith.mulf %33, %32 : vector<16x128xf32>
    %35 = arith.addf %28, %34 : vector<16x128xf32>
    %cst_19 = arith.constant 0.797884583 : f32
    %36 = vector.broadcast %cst_19 : f32 to vector<16x128xf32>
    %37 = arith.mulf %36, %35 : vector<16x128xf32>
    %38 = math.tanh %37 : vector<16x128xf32>
    %cst_20 = arith.constant 1.000000e+00 : f32
    %39 = vector.broadcast %cst_20 : f32 to vector<16x128xf32>
    %40 = arith.addf %39, %38 : vector<16x128xf32>
    %41 = arith.mulf %31, %40 : vector<16x128xf32>
    %42 = arith.truncf %41 : vector<16x128xf32> to vector<16x128xbf16>
    %c2 = arith.constant 2 : index
    %c0_21 = arith.constant 0 : index
    %c0_22 = arith.constant 0 : index
    %43 = vector.load %arg2[%c2, %c0_21, %c0_22] : memref<3x128x128xbf16, #tpu.memory_space<vmem>>, vector<1x128x128xbf16>
    %44 = vector.shape_cast %43 : vector<1x128x128xbf16> to vector<128x128xbf16>
    %cst_23 = arith.constant dense<0.000000e+00> : vector<16x128xf32>
    %45 = tpu.matmul %42, %44, %cst_23 {dimension_numbers = #tpu.dot_dimension_numbers<[1], [0], [0], [1], [0, 0, 1, 1], [], []>} : vector<16x128xbf16>, vector<128x128xbf16>, vector<16x128xf32> -> vector<16x128xf32>
    %c2_24 = arith.constant 2 : index
    %c0_25 = arith.constant 0 : index
    %c0_26 = arith.constant 0 : index
    %46 = vector.load %arg3[%c2_24, %c0_25, %c0_26] : memref<3x1x128xf32, #tpu.memory_space<vmem>>, vector<1x1x128xf32>
    %47 = vector.shape_cast %46 : vector<1x1x128xf32> to vector<1x128xf32>
    %48 = vector.broadcast %47 : vector<1x128xf32> to vector<16x128xf32>
    %49 = arith.addf %45, %48 : vector<16x128xf32>
    %c0_27 = arith.constant 0 : index
    %c0_28 = arith.constant 0 : index
    %50 = vector.load %arg4[%c0_27, %c0_28] : memref<16x128xf32, #tpu.memory_space<vmem>>, vector<16x128xf32>
    tpu.vector_store %arg4[%c0_27, %c0_28], %49 {strides = array<i32>} : memref<16x128xf32, #tpu.memory_space<vmem>>, vector<16x128xf32>,
    return
  }
  func.func @transform_0(%arg0: i32) -> (i32, i32) {
    %c0_i32 = arith.constant 0 : i32
    %c0_i32_0 = arith.constant 0 : i32
    return %arg0, %c0_i32 : i32, i32
  }
  func.func @transform_1(%arg0: i32) -> (i32, i32, i32) {
    %c0_i32 = arith.constant 0 : i32
    %c0_i32_0 = arith.constant 0 : i32
    %c0_i32_1 = arith.constant 0 : i32
    %c0_i32_2 = arith.constant 0 : i32
    return %c0_i32, %c0_i32_0, %c0_i32_1 : i32, i32, i32
  }
  func.func @transform_2(%arg0: i32) -> (i32, i32, i32) {
    %c0_i32 = arith.constant 0 : i32
    %c0_i32_0 = arith.constant 0 : i32
    %c0_i32_1 = arith.constant 0 : i32
    %c0_i32_2 = arith.constant 0 : i32
    return %c0_i32, %c0_i32_0, %c0_i32_1 : i32, i32, i32
  }
  func.func @transform_3(%arg0: i32) -> (i32, i32) {
    %c0_i32 = arith.constant 0 : i32
    %c0_i32_0 = arith.constant 0 : i32
    return %arg0, %c0_i32 : i32, i32
  }
}

</mosaic_0001>

<bundles_post_ra>
// kernel: mlp_forward.1
= control target key start
LH: loop header
LB: loop body
LE: loop exit
PB: predicated region body
PF: predicated region fallthrough
CT: control target
= control target key end

     0   :  { %v591_v0 = vmov 0.0   ;;  %vm592_vm0 = vmmov 0   ;;  %s733_s1 = inlined_call_operand.vmem [shape: bf16[3,128,128], index: 1, kind: input, shape index: {}]   ;;  %s734_s0 = inlined_call_operand.vmem [shape: bf16[16,128], index: 0, kind: input, shape index: {}]   ;;  %s735_s2 = inlined_call_operand.vmem [shape: f32[3,1,128], index: 2, kind: input, shape index: {}]   ;;  %s736_s3 = inlined_call_operand.vmem [shape: f32[16,128], index: 3, kind: output, shape index: {}]  }
   0x1   :  { %496 = vmatprep.subr.bf16.mxu0 %v591_v0  ;;  %v558_v1 = vld [vmem:[%s733_s1] sm:$0xff]   ;;  %512 = vmatprep.mubr.msk.bf16.mxu0 %vm592_vm0, %v591_v0  ;;  %v559_v2 = vld [vmem:[%s733_s1 + $0x8] sm:$0xff]   ;;  %v560_v3 = vld [vmem:[%s733_s1 + $0x10] sm:$0xff]  }
   0x2   :  { %516 = vmatprep.subr.bf16.mxu1 %v591_v0  ;;  %532 = vmatprep.mubr.msk.bf16.mxu1 %vm592_vm0, %v591_v0  ;;  %v561_v4 = vld [vmem:[%s733_s1 + $0x18] sm:$0xff]   ;;  %v562_v5 = vld [vmem:[%s733_s1 + $0x20] sm:$0xff]   ;;  %v563_v6 = vld [vmem:[%s733_s1 + $0x28] sm:$0xff]  }
   0x3   :  { %497 = vmatpush3.bf16.msra.mxu0 %v558_v1  ;;  %v564_v7 = vld [vmem:[%s733_s1 + $0x30] sm:$0xff]   ;;  %v565_v8 = vld [vmem:[%s733_s1 + $0x38] sm:$0xff]   ;;  %v566_v9 = vld [vmem:[%s734_s0] sm:$0xff]  }
   0x4   :  { %498 = vmatprep.subr.bf16.mxu0 %v591_v0  ;;  %v567_v10 = vld [vmem:[%s733_s1 + $0x40] sm:$0xff]   ;;  %v568_v11 = vld [vmem:[%s733_s1 + $0x48] sm:$0xff]   ;;  %v569_v12 = vld [vmem:[%s733_s1 + $0x50] sm:$0xff]  }
   0x5   :  { %517 = vmatpush3.bf16.msra.mxu1 %v567_v10  ;;  %v570_v13 = vld [vmem:[%s733_s1 + $0x58] sm:$0xff]   ;;  %v571_v14 = vld [vmem:[%s733_s1 + $0x60] sm:$0xff]   ;;  %v572_v15 = vld [vmem:[%s733_s1 + $0x68] sm:$0xff]  }
   0x6   :  { %518 = vmatprep.subr.bf16.mxu1 %v591_v0  ;;  %v573_v16 = vld [vmem:[%s733_s1 + $0x70] sm:$0xff]   ;;  %v574_v17 = vld [vmem:[%s733_s1 + $0x78] sm:$0xff]   ;;  %v407_v18 = vld [vmem:[%s735_s2] ss:$0 sm:$0xff] }
   0x7   :  { %499 = vmatpush3.bf16.msra.mxu0 %v559_v2  ;;  %v575_v44 = vld [vmem:[%s733_s1 + $0x80] sm:$0xff]   ;;  %v576_v45 = vld [vmem:[%s733_s1 + $0x88] sm:$0xff]   ;;  %v577_v46 = vld [vmem:[%s733_s1 + $0x90] sm:$0xff]  }
   0x8   :  { %500 = vmatprep.subr.bf16.mxu0 %v591_v0  ;;  %v578_v47 = vld [vmem:[%s733_s1 + $0x98] sm:$0xff]   ;;  %v579_v48 = vld [vmem:[%s733_s1 + $0xa0] sm:$0xff]   ;;  %v580_v49 = vld [vmem:[%s733_s1 + $0xa8] sm:$0xff]  }
   0x9   :  { %519 = vmatpush3.bf16.msra.mxu1 %v568_v11  ;;  %v581_v50 = vld [vmem:[%s733_s1 + $0xb0] sm:$0xff]   ;;  %v582_v51 = vld [vmem:[%s733_s1 + $0xb8] sm:$0xff]   ;;  %v434_v52 = vld [vmem:[%s735_s2 + $0x1] ss:$0 sm:$0xff] }
   0xa   :  { %520 = vmatprep.subr.bf16.mxu1 %v591_v0 }
   0xb   :  { %501 = vmatpush3.bf16.msra.mxu0 %v560_v3 }
   0xc   :  { %502 = vmatprep.subr.bf16.mxu0 %v591_v0 }
   0xd   :  { %521 = vmatpush3.bf16.msra.mxu1 %v569_v12 }
   0xe   :  { %522 = vmatprep.subr.bf16.mxu1 %v591_v0 }
   0xf   :  { %503 = vmatpush3.bf16.msra.mxu0 %v561_v4 }
  0x10   :  { %504 = vmatprep.subr.bf16.mxu0 %v591_v0 }
  0x11   :  { %523 = vmatpush3.bf16.msra.mxu1 %v570_v13 }
  0x12   :  { %524 = vmatprep.subr.bf16.mxu1 %v591_v0 }
  0x13   :  { %505 = vmatpush3.bf16.msra.mxu0 %v562_v5 }
  0x14   :  { %506 = vmatprep.subr.bf16.mxu0 %v591_v0 }
  0x15   :  { %525 = vmatpush3.bf16.msra.mxu1 %v571_v14  ;;  %v460_v14 = vld [vmem:[%s735_s2 + $0x2] ss:$0 sm:$0xff] }
  0x16   :  { %526 = vmatprep.subr.bf16.mxu1 %v591_v0 }
  0x17   :  { %507 = vmatpush3.bf16.msra.mxu0 %v563_v6 }
  0x18   :  { %508 = vmatprep.subr.bf16.mxu0 %v591_v0 }
  0x19   :  { %527 = vmatpush3.bf16.msra.mxu1 %v572_v15 }
  0x1a   :  { %528 = vmatprep.subr.bf16.mxu1 %v591_v0 }
  0x1b   :  { %509 = vmatpush3.bf16.msra.mxu0 %v564_v7 }
  0x1c   :  { %510 = vmatprep.subr.bf16.mxu0 %v591_v0 }
  0x1d   :  { %529 = vmatpush3.bf16.msra.mxu1 %v573_v16 }
  0x1e   :  { %530 = vmatprep.subr.bf16.mxu1 %v591_v0 }
  0x1f   :  { %511 = vmatpush3.bf16.msra.mxu0 %v565_v8 }
  0x20   :  { %536 = vmatprep.subr.bf16.mxu0 %v591_v0 }
  0x21   :  { %531 = vmatpush3.bf16.msra.mxu1 %v574_v17 }
  0x22   :  { %513 = vmatmul.mubr.bf16.vlgmr.msra.gmra.mrb[0].mxu0 %v566_v9 }
  0x23   :  { %552 = vmatprep.mubr.msk.bf16.mxu0 %vm592_vm0, %v591_v0  ;;  %537 = vmatpush3.bf16.msra.mxu0 %v575_v44 }
  0x24   :  { %538 = vmatprep.subr.bf16.mxu0 %v591_v0 }
  0x27   :  { %539 = vmatpush3.bf16.msra.mxu0 %v576_v45 }
  0x28   :  { %540 = vmatprep.subr.bf16.mxu0 %v591_v0 }
  0x2b   :  { %541 = vmatpush3.bf16.msra.mxu0 %v577_v46 }
  0x2c   :  { %542 = vmatprep.subr.bf16.mxu0 %v591_v0 }
  0x2f   :  { %543 = vmatpush3.bf16.msra.mxu0 %v578_v47 }
  0x30   :  { %544 = vmatprep.subr.bf16.mxu0 %v591_v0 }
  0x33   :  { %545 = vmatpush3.bf16.msra.mxu0 %v579_v48 }
  0x34   :  { %546 = vmatprep.subr.bf16.mxu0 %v591_v0 }
  0x37   :  { %547 = vmatpush3.bf16.msra.mxu0 %v580_v49 }
  0x38   :  { %548 = vmatprep.subr.bf16.mxu0 %v591_v0 }
  0x3b   :  { %549 = vmatpush3.bf16.msra.mxu0 %v581_v50 }
  0x3c   :  { %550 = vmatprep.subr.bf16.mxu0 %v591_v0 }
  0x3f   :  { %551 = vmatpush3.bf16.msra.mxu0 %v582_v51 }
  0xf5   :  { %v128_v19 = vpop.f32.mrb[0].mxu0 }
  0xf6   :  { %v129_v20 = vadd.f32 %v407_v18, %v128_v19  ;;  %v514_v21 = vpop.f32.mrb[1].mxu0 }
  0xf7   :  { %v131_v22 = vpop.f32.mrb[2].mxu0 }
  0xf8   :  { %v135_v23 = vmul.f32 %v129_v20, %v129_v20  ;;  %v132_v24 = vadd.f32 %v407_v18, %v131_v22  ;;  %v515_v25 = vpop.f32.mrb[3].mxu0  ;;  %v137_v38 = vmul.f32 0.5, %v129_v20 }
  0xfa   :  { %v139_v26 = vmul.f32 %v135_v23, %v129_v20  ;;  %v136_v27 = vmul.f32 %v132_v24, %v132_v24  ;;  %v138_v39 = vmul.f32 0.5, %v132_v24 }
  0xfc   :  { %v141_v28 = vmul.f32 0.044715, %v139_v26  ;;  %v140_v29 = vmul.f32 %v136_v27, %v132_v24 }
  0xfe   :  { %v143_v30 = vadd.f32 %v141_v28, %v129_v20  ;;  %v142_v31 = vmul.f32 0.044715, %v140_v29 }
 0x100   :  { %v145_v32 = vmul.f32 0.7978846, %v143_v30  ;;  %v144_v33 = vadd.f32 %v142_v31, %v132_v24 }
 0x102   :  { %583 = vtanh.f32 %v145_v32  ;;  %v146_v34 = vmul.f32 0.7978846, %v144_v33 }
 0x104   :  { %585 = vtanh.f32 %v146_v34 }
 0x10c   :  { %v584_v35 = vpop.eup %583 }
 0x10d   :  { %v149_v36 = vadd.f32 1.0, %v584_v35 }
 0x10e   :  { %v586_v37 = vpop.eup %585 }
 0x10f   :  { %v150_v40 = vadd.f32 1.0, %v586_v37  ;;  %v151_v41 = vmul.f32 %v149_v36, %v137_v38 }
 0x111   :  { %v152_v42 = vmul.f32 %v150_v40, %v138_v39 }
 0x113   :  { %v153_v43 = vpack.c.bf16 %v152_v42, %v151_v41 }
 0x115   :  { %533 = vmatmul.mubr.bf16.vlgmr.msra.gmra.mrb[0].mxu1 %v153_v43 }
 0x1e8   :  { %v261_v53 = vpop.f32.mrb[0].mxu1 }
 0x1e9   :  { %v262_v54 = vadd.f32 %v434_v52, %v261_v53  ;;  %v534_v55 = vpop.f32.mrb[1].mxu1 }
 0x1ea   :  { %v264_v56 = vpop.f32.mrb[2].mxu1 }
 0x1eb   :  { %v268_v57 = vmul.f32 %v262_v54, %v262_v54  ;;  %v265_v58 = vadd.f32 %v434_v52, %v264_v56  ;;  %v535_v59 = vpop.f32.mrb[3].mxu1  ;;  %v270_v8 = vmul.f32 0.5, %v262_v54 }
 0x1ed   :  { %v272_v60 = vmul.f32 %v268_v57, %v262_v54  ;;  %v269_v61 = vmul.f32 %v265_v58, %v265_v58  ;;  %v271_v9 = vmul.f32 0.5, %v265_v58 }
 0x1ef   :  { %v274_v62 = vmul.f32 0.044715, %v272_v60  ;;  %v273_v63 = vmul.f32 %v269_v61, %v265_v58 }
 0x1f1   :  { %v276_v1 = vadd.f32 %v274_v62, %v262_v54  ;;  %v275_v2 = vmul.f32 0.044715, %v273_v63 }
 0x1f3   :  { %v278_v3 = vmul.f32 0.7978846, %v276_v1  ;;  %v277_v0 = vadd.f32 %v275_v2, %v265_v58 }
 0x1f5   :  { %587 = vtanh.f32 %v278_v3  ;;  %v279_v4 = vmul.f32 0.7978846, %v277_v0 }
 0x1f7   :  { %589 = vtanh.f32 %v279_v4 }
 0x1ff   :  { %v588_v5 = vpop.eup %587 }
 0x200   :  { %v282_v6 = vadd.f32 1.0, %v588_v5 }
 0x201   :  { %v590_v7 = vpop.eup %589 }
 0x202   :  { %v283_v10 = vadd.f32 1.0, %v590_v7  ;;  %v284_v11 = vmul.f32 %v282_v6, %v270_v8 }
 0x204   :  { %v285_v12 = vmul.f32 %v283_v10, %v271_v9 }
 0x206   :  { %v286_v13 = vpack.c.bf16 %v285_v12, %v284_v11 }
 0x208   :  { %553 = vmatmul.mubr.bf16.vlgmr.msra.gmra.mrb[4].mxu0 %v286_v13 }
 0x2db   :  { %v394_v15 = vpop.f32.mrb[4].mxu0 }
 0x2dc   :  { %v395_v16 = vadd.f32 %v460_v14, %v394_v15  ;;  %v554_v17 = vpop.f32.mrb[5].mxu0 }
 0x2dd   :  { %v397_v18 = vpop.f32.mrb[6].mxu0 }
 0x2de   :  { %401 = vst [vmem:[%s736_s3] sm:$0xff] %v395_v16  ;;  %v398_v19 = vadd.f32 %v460_v14, %v397_v18  ;;  %v555_v20 = vpop.f32.mrb[7].mxu0 }
 0x2e0   :  { %402 = vst [vmem:[%s736_s3 + $0x8] sm:$0xff] %v398_v19 }

</bundles_post_ra>
